<compile_context>
chip_gen: v7x
topology: tpu7x:2x2x1
jax: 0.10.0
libtpu: 0.0.40
codegen_flags: <defaults>
</compile_context>

<pallas_src>
import functools

import jax
import jax.numpy as jnp
from jax.experimental import pallas as pl
from jax.experimental.pallas import tpu as pltpu


def _head_kernel(x_ref, w1_ref, b1_ref, w2_ref, b2_ref, o_ref, acc_ref, *,
                 hw_total, tile_hw):
    # x_ref : (TILE_N, C, TILE_HW)  NCHW-native, HW on lanes
    # w1_ref: (C, HIDDEN) f32 (1/HW folded in)     b1_ref: (1, HIDDEN)
    # w2_ref: (HIDDEN, KP) f32 zero-padded cols    b2_ref: (1, KP) (-1e30 pad)
    # o_ref : (TILE_N, KP)                          acc_ref: (TILE_N, C) f32
    j = pl.program_id(1)
    num_hw = pl.num_programs(1)

    @pl.when(j == 0)
    def _init():
        acc_ref[...] = jnp.zeros_like(acc_ref)

    # Upcast inside the kernel so bf16-streamed x still accumulates in f32.
    xf = x_ref[...].astype(jnp.float32)

    rem = hw_total % tile_hw
    if rem == 0:
        # Common case: no masking anywhere in the hot loop.
        acc_ref[...] += jnp.sum(xf, axis=-1)            # lane (XLU) reduce
    else:
        @pl.when(j < num_hw - 1)
        def _full_step():
            acc_ref[...] += jnp.sum(xf, axis=-1)

        @pl.when(j == num_hw - 1)
        def _partial_step():
            lane = jax.lax.broadcasted_iota(jnp.int32, xf.shape, 2)
            acc_ref[...] += jnp.sum(jnp.where(lane < rem, xf, 0.0), axis=-1)

    @pl.when(j == num_hw - 1)
    def _finalize():
        pooled = acc_ref[...]                            # == mean(x) * HW
        # fc_1 (1/HW folded into w1), dropout = identity (eval), ReLU6.
        h = jnp.dot(pooled, w1_ref[...],
                    preferred_element_type=jnp.float32) + b1_ref[...]
        h = jnp.clip(h, 0.0, 6.0)
        # fc_2 into the lane-dense padded class slab.
        logits = jnp.dot(h, w2_ref[...],
                         preferred_element_type=jnp.float32) + b2_ref[...]
        # Softmax (padded columns have bias -1e30 -> exp underflows to 0).
        m = jnp.max(logits, axis=-1, keepdims=True)
        e = jnp.exp(logits - m)
        o_ref[...] = (e / jnp.sum(e, axis=-1, keepdims=True)).astype(o_ref.dtype)


def _vmem_capacity_bytes():
    try:
        return int(pltpu.get_tpu_info().vmem_capacity_bytes)
    except Exception:
        return 64 * 1024 * 1024          # conservative (v7x per-core VMEM)


def _choose_tiles(n, c, hw, x_itemsize, x_tile_budget):
    """Pick (tile_n, tile_hw) for the x block (tile_n, C, tile_hw)."""
    # N axis is "parallel": for large N keep >= 2 blocks so both v7x cores get
    # work; blocks that are not the full axis must be a multiple of 8.
    if n >= 16:
        tile_n = max(8, min(256, (((n + 1) // 2) // 8) * 8))
    else:
        tile_n = n
    min_hw = hw if hw <= 128 else 128
    while tile_n > 8 and tile_n * c * min_hw * x_itemsize > x_tile_budget:
        tile_n = max(8, ((tile_n // 2) // 8) * 8)

    max_hw = max(1, x_tile_budget // max(1, tile_n * c * x_itemsize))
    if max_hw >= hw or hw <= 128:
        tile_hw = hw
    else:
        # Prefer an exact divisor of HW that is a multiple of 128 (no masking).
        best = 0
        d = 128
        while d <= min(hw, max_hw):
            if hw % d == 0:
                best = d
            d += 128
        tile_hw = best if best else max(128, (max_hw // 128) * 128)
    return int(tile_n), int(tile_hw)


def classification_head_simple(x_nchw, w1, b1, w2, b2):
    """x_nchw: (N, C, H, W), any float dtype (bf16 streaming supported).
    w1: (C//2, C), b1: (C//2,), w2: (K, C//2), b2: (K,)  (PyTorch Linear layout).
    Returns (N, K) f32 softmax probabilities."""
    N, C, H, W = x_nchw.shape
    HW = H * W
    hidden = w1.shape[0]
    K = w2.shape[0]
    KP = ((K + 127) // 128) * 128        # lane-dense padded class dim

    # NCHW-native: pure reshape, no relayout, no extra HBM pass over x.
    x = x_nchw.reshape(N, C, HW)
    x_itemsize = jnp.dtype(x.dtype).itemsize

    inv_hw = 1.0 / float(HW)
    w1_t = jnp.asarray(w1, jnp.float32).T * inv_hw                    # (C, hidden)
    b1_2d = jnp.asarray(b1, jnp.float32).reshape(1, hidden)
    w2_t = jnp.zeros((hidden, KP), jnp.float32)
    w2_t = w2_t.at[:, :K].set(jnp.asarray(w2, jnp.float32).T)         # (hidden, KP)
    b2_2d = jnp.full((1, KP), -1e30, jnp.float32)
    b2_2d = b2_2d.at[0, :K].set(jnp.asarray(b2, jnp.float32))

    # Generation-aware VMEM budgeting: account for double-buffered weights,
    # the f32 accumulator and the double-buffered output, not just the x tile.
    vmem_cap = _vmem_capacity_bytes()
    weights_bytes = (C * hidden + hidden + hidden * KP + KP) * 4
    tile_n_ub = N if N < 16 else 256
    fixed_bytes = 2 * weights_bytes + tile_n_ub * C * 4 + 2 * tile_n_ub * KP * 4
    x_tile_budget = min(vmem_cap // 8,   # ~16 MiB on v5e/v6e, ~8 MiB on v7x
                        max(2 << 20, (int(0.7 * vmem_cap) - fixed_bytes) // 2))
    tile_n, tile_hw = _choose_tiles(N, C, HW, x_itemsize, x_tile_budget)

    x_tile_bytes = tile_n * C * tile_hw * x_itemsize
    needed = (2 * x_tile_bytes + 2 * weights_bytes
              + tile_n * C * 4 + 2 * tile_n * KP * 4)
    vmem_limit = int(max(16 << 20, min(int(0.75 * vmem_cap), needed + (8 << 20))))

    grid = (pl.cdiv(N, tile_n), pl.cdiv(HW, tile_hw))
    kernel = functools.partial(_head_kernel, hw_total=HW, tile_hw=tile_hw)

    out_padded = pl.pallas_call(
        kernel,
        out_shape=jax.ShapeDtypeStruct((N, KP), jnp.float32),
        grid=grid,
        in_specs=[
            # x: streamed / pipelined over (N, HW) tiles, HW on lanes.
            pl.BlockSpec((tile_n, C, tile_hw), lambda i, j: (i, 0, j)),
            # Weights/biases: constant index maps -> VMEM-resident across tiles.
            pl.BlockSpec((C, hidden), lambda i, j: (0, 0)),
            pl.BlockSpec((1, hidden), lambda i, j: (0, 0)),
            pl.BlockSpec((hidden, KP), lambda i, j: (0, 0)),
            pl.BlockSpec((1, KP), lambda i, j: (0, 0)),
        ],
        out_specs=pl.BlockSpec((tile_n, KP), lambda i, j: (i, 0)),
        scratch_shapes=[pltpu.VMEM((tile_n, C), jnp.float32)],
        compiler_params=pltpu.CompilerParams(
            dimension_semantics=("parallel", "arbitrary"),
            vmem_limit_bytes=vmem_limit,
        ),
    )(x, w1_t, b1_2d, w2_t, b2_2d)

    return out_padded[:, :K]


def _init_linear(key, out_features, in_features):
    # PyTorch nn.Linear default init: U(-1/sqrt(in), 1/sqrt(in)).
    kw, kb = jax.random.split(key)
    bound = 1.0 / jnp.sqrt(jnp.asarray(in_features, jnp.float32))
    w = jax.random.uniform(kw, (out_features, in_features),
                           jnp.float32, -bound, bound)
    b = jax.random.uniform(kb, (out_features,), jnp.float32, -bound, bound)
    return w, b


if __name__ == "__main__":
    # Small shapes consistent with the module: NCHW input.
    N, C, H, W = 2, 4, 16, 16
    num_classes = 3
    hidden = C // 2

    key = jax.random.PRNGKey(0)
    kx, k1, k2 = jax.random.split(key, 3)

    x = jax.random.normal(kx, (N, C, H, W), jnp.float32)
    w1, b1 = _init_linear(k1, hidden, C)             # fc_1: (C//2, C)
    w2, b2 = _init_linear(k2, num_classes, hidden)   # fc_2: (K, C//2)

    out = classification_head_simple(x, w1, b1, w2, b2)
    out = jax.block_until_ready(out)

    # Reference in plain JAX (same math; softmax assumed for `act`).
    pooled = jnp.mean(x.reshape(N, C, H * W), axis=-1)
    h_ref = jnp.clip(pooled @ w1.T + b1, 0.0, 6.0)
    ref = jax.nn.softmax(h_ref @ w2.T + b2, axis=-1)

    assert out.shape == (N, num_classes)
    assert jnp.allclose(out, ref, atol=1e-4, rtol=1e-4), "mismatch vs reference"

    print("KERNEL_OK")
</pallas_src>

<mosaic_0001>
module attributes {stable_mosaic.version = 11 : i64} {
  func.func @_head_kernel(%arg0: i32, %arg1: i32, %arg2: memref<2x4x256xf32, #tpu.memory_space<vmem>>, %arg3: memref<4x2xf32, #tpu.memory_space<vmem>>, %arg4: memref<1x2xf32, #tpu.memory_space<vmem>>, %arg5: memref<2x128xf32, #tpu.memory_space<vmem>>, %arg6: memref<1x128xf32, #tpu.memory_space<vmem>>, %arg7: memref<2x128xf32, #tpu.memory_space<vmem>>, %arg8: memref<2x4xf32, #tpu.memory_space<vmem>>) attributes {dimension_semantics = [#tpu.dimension_semantics<parallel>, #tpu.dimension_semantics<arbitrary>], iteration_bounds = array<i64: 1, 1>, scalar_prefetch = 0 : i64, scratch_operands = 1 : i64, tpu.core_type = #tpu.core_type<tc>, window_params = [{transform_indices = @transform_0, window_bounds = array<i64: 2, 4, 256>}, {pipeline_mode = #tpu.pipeline_mode<synchronous>, transform_indices = @transform_1, window_bounds = array<i64: 4, 2>}, {pipeline_mode = #tpu.pipeline_mode<synchronous>, transform_indices = @transform_2, window_bounds = array<i64: 1, 2>}, {pipeline_mode = #tpu.pipeline_mode<synchronous>, transform_indices = @transform_3, window_bounds = array<i64: 2, 128>}, {pipeline_mode = #tpu.pipeline_mode<synchronous>, transform_indices = @transform_4, window_bounds = array<i64: 1, 128>}, {transform_indices = @transform_5, window_bounds = array<i64: 2, 128>}]} {
    %c0_i32 = arith.constant 0 : i32
    %0 = arith.cmpi eq, %arg1, %c0_i32 : i32
    %1 = arith.extui %0 : i1 to i32
    %c0_i32_0 = arith.constant 0 : i32
    %2 = arith.cmpi ne, %1, %c0_i32_0 : i32
    scf.if %2 {
      %cst_9 = arith.constant 0.000000e+00 : f32
      %11 = vector.broadcast %cst_9 : f32 to vector<2x4xf32>
      %c0_10 = arith.constant 0 : index
      %c0_11 = arith.constant 0 : index
      %12 = vector.load %arg8[%c0_10, %c0_11] : memref<2x4xf32, #tpu.memory_space<vmem>>, vector<2x4xf32>
      tpu.vector_store %arg8[%c0_10, %c0_11], %11 {strides = array<i32>} : memref<2x4xf32, #tpu.memory_space<vmem>>, vector<2x4xf32>,
    } else {
    }
    %c0 = arith.constant 0 : index
    %c0_1 = arith.constant 0 : index
    %c0_2 = arith.constant 0 : index
    %3 = vector.load %arg2[%c0, %c0_1, %c0_2] : memref<2x4x256xf32, #tpu.memory_space<vmem>>, vector<2x4x256xf32>
    %c0_3 = arith.constant 0 : index
    %c0_4 = arith.constant 0 : index
    %4 = vector.load %arg8[%c0_3, %c0_4] : memref<2x4xf32, #tpu.memory_space<vmem>>, vector<2x4xf32>
    %cst = arith.constant dense<0.000000e+00> : vector<2x4xf32>
    %5 = vector.multi_reduction <add>, %3, %cst [2] : vector<2x4x256xf32> to vector<2x4xf32>
    %6 = arith.addf %4, %5 : vector<2x4xf32>
    %c0_5 = arith.constant 0 : index
    %c0_6 = arith.constant 0 : index
    %7 = vector.load %arg8[%c0_5, %c0_6] : memref<2x4xf32, #tpu.memory_space<vmem>>, vector<2x4xf32>
    tpu.vector_store %arg8[%c0_5, %c0_6], %6 {strides = array<i32>} : memref<2x4xf32, #tpu.memory_space<vmem>>, vector<2x4xf32>,
    %c0_i32_7 = arith.constant 0 : i32
    %8 = arith.cmpi eq, %arg1, %c0_i32_7 : i32
    %9 = arith.extui %8 : i1 to i32
    %c0_i32_8 = arith.constant 0 : i32
    %10 = arith.cmpi ne, %9, %c0_i32_8 : i32
    scf.if %10 {
      %c0_9 = arith.constant 0 : index
      %c0_10 = arith.constant 0 : index
      %11 = vector.load %arg8[%c0_9, %c0_10] : memref<2x4xf32, #tpu.memory_space<vmem>>, vector<2x4xf32>
      %c0_11 = arith.constant 0 : index
      %c0_12 = arith.constant 0 : index
      %12 = vector.load %arg3[%c0_11, %c0_12] : memref<4x2xf32, #tpu.memory_space<vmem>>, vector<4x2xf32>
      %cst_13 = arith.constant dense<0.000000e+00> : vector<2x2xf32>
      %13 = tpu.matmul %11, %12, %cst_13 {dimension_numbers = #tpu.dot_dimension_numbers<[1], [0], [0], [1], [0, 0, 1, 1], [], []>} : vector<2x4xf32>, vector<4x2xf32>, vector<2x2xf32> -> vector<2x2xf32>
      %c0_14 = arith.constant 0 : index
      %c0_15 = arith.constant 0 : index
      %14 = vector.load %arg4[%c0_14, %c0_15] : memref<1x2xf32, #tpu.memory_space<vmem>>, vector<1x2xf32>
      %15 = vector.broadcast %14 : vector<1x2xf32> to vector<2x2xf32>
      %16 = arith.addf %13, %15 : vector<2x2xf32>
      %cst_16 = arith.constant 0.000000e+00 : f32
      %cst_17 = arith.constant 6.000000e+00 : f32
      %17 = vector.broadcast %cst_16 : f32 to vector<2x2xf32>
      %18 = arith.maximumf %17, %16 : vector<2x2xf32>
      %19 = vector.broadcast %cst_17 : f32 to vector<2x2xf32>
      %20 = arith.minimumf %19, %18 : vector<2x2xf32>
      %c0_18 = arith.constant 0 : index
      %c0_19 = arith.constant 0 : index
      %21 = vector.load %arg5[%c0_18, %c0_19] : memref<2x128xf32, #tpu.memory_space<vmem>>, vector<2x128xf32>
      %cst_20 = arith.constant dense<0.000000e+00> : vector<2x128xf32>
      %22 = tpu.matmul %20, %21, %cst_20 {dimension_numbers = #tpu.dot_dimension_numbers<[1], [0], [0], [1], [0, 0, 1, 1], [], []>} : vector<2x2xf32>, vector<2x128xf32>, vector<2x128xf32> -> vector<2x128xf32>
      %c0_21 = arith.constant 0 : index
      %c0_22 = arith.constant 0 : index
      %23 = vector.load %arg6[%c0_21, %c0_22] : memref<1x128xf32, #tpu.memory_space<vmem>>, vector<1x128xf32>
      %24 = vector.broadcast %23 : vector<1x128xf32> to vector<2x128xf32>
      %25 = arith.addf %22, %24 : vector<2x128xf32>
      %cst_23 = arith.constant dense<0xFF800000> : vector<2xf32>
      %26 = vector.multi_reduction <maximumf>, %25, %cst_23 [1] : vector<2x128xf32> to vector<2xf32>
      %27 = vector.shape_cast %26 : vector<2xf32> to vector<2x1xf32>
      %28 = vector.broadcast %27 : vector<2x1xf32> to vector<2x128xf32>
      %29 = arith.subf %25, %28 : vector<2x128xf32>
      %30 = math.exp %29 : vector<2x128xf32>
      %cst_24 = arith.constant dense<0.000000e+00> : vector<2xf32>
      %31 = vector.multi_reduction <add>, %30, %cst_24 [1] : vector<2x128xf32> to vector<2xf32>
      %32 = vector.shape_cast %31 : vector<2xf32> to vector<2x1xf32>
      %33 = vector.broadcast %32 : vector<2x1xf32> to vector<2x128xf32>
      %34 = arith.divf %30, %33 : vector<2x128xf32>
      %c0_25 = arith.constant 0 : index
      %c0_26 = arith.constant 0 : index
      %35 = vector.load %arg7[%c0_25, %c0_26] : memref<2x128xf32, #tpu.memory_space<vmem>>, vector<2x128xf32>
      tpu.vector_store %arg7[%c0_25, %c0_26], %34 {strides = array<i32>} : memref<2x128xf32, #tpu.memory_space<vmem>>, vector<2x128xf32>,
    } else {
    }
    return
  }
  func.func @transform_0(%arg0: i32, %arg1: i32) -> (i32, i32, i32) {
    %c0_i32 = arith.constant 0 : i32
    %c0_i32_0 = arith.constant 0 : i32
    return %arg0, %c0_i32, %arg1 : i32, i32, i32
  }
  func.func @transform_1(%arg0: i32, %arg1: i32) -> (i32, i32) {
    %c0_i32 = arith.constant 0 : i32
    %c0_i32_0 = arith.constant 0 : i32
    %c0_i32_1 = arith.constant 0 : i32
    return %c0_i32, %c0_i32_0 : i32, i32
  }
  func.func @transform_2(%arg0: i32, %arg1: i32) -> (i32, i32) {
    %c0_i32 = arith.constant 0 : i32
    %c0_i32_0 = arith.constant 0 : i32
    %c0_i32_1 = arith.constant 0 : i32
    return %c0_i32, %c0_i32_0 : i32, i32
  }
  func.func @transform_3(%arg0: i32, %arg1: i32) -> (i32, i32) {
    %c0_i32 = arith.constant 0 : i32
    %c0_i32_0 = arith.constant 0 : i32
    %c0_i32_1 = arith.constant 0 : i32
    return %c0_i32, %c0_i32_0 : i32, i32
  }
  func.func @transform_4(%arg0: i32, %arg1: i32) -> (i32, i32) {
    %c0_i32 = arith.constant 0 : i32
    %c0_i32_0 = arith.constant 0 : i32
    %c0_i32_1 = arith.constant 0 : i32
    return %c0_i32, %c0_i32_0 : i32, i32
  }
  func.func @transform_5(%arg0: i32, %arg1: i32) -> (i32, i32) {
    %c0_i32 = arith.constant 0 : i32
    %c0_i32_0 = arith.constant 0 : i32
    return %arg0, %c0_i32 : i32, i32
  }
}

</mosaic_0001>

<bundles_post_ra>
// kernel: tpu_custom_call.1
= control target key start
LH: loop header
LB: loop body
LE: loop exit
PB: predicated region body
PF: predicated region fallthrough
CT: control target
= control target key end

     0   :  { %10 = vsyncpa [#allocation4], 0  ;;  %s445_s0 = inlined_call_operand.hbm [shape: f32[2,4,256], index: 0, kind: input, shape index: {}]   ;;  %s446_s1 = inlined_call_operand.vmem [shape: f32[4,2], index: 1, kind: input, shape index: {}]   ;;  %s447_s2 = inlined_call_operand.vmem [shape: f32[1,2], index: 2, kind: input, shape index: {}]   ;;  %s448_s3 = inlined_call_operand.vmem [shape: f32[2,128], index: 3, kind: input, shape index: {}]   ;;  %s449_s4 = inlined_call_operand.vmem [shape: f32[1,128], index: 4, kind: input, shape index: {}]   ;;  %s450_s5 = inlined_call_operand.hbm [shape: f32[2,128], index: 5, kind: output, shape index: {}]  }
   0x1   :  { %11 = vsyncpa [#allocation5], 0  ;;  %s363_s18 = smov [#allocation3]   ;;  %s315_s22 = scalar_lea.hbm %s445_s0, 256 }
   0x2   :  { %s17_s19 = sshll.u32 %s363_s18, 4  ;;  %p316_p0 = scmp.ne.s32.totalorder %s445_s0, %s315_s22  ;;  %s18_s19 = int_to_ptr.vmem [resolvable:$true] %s17_s19 }
   0x3   :  { %p319_p1 = scmp.lt.u32.totalorder %s315_s22, %s445_s0 }
   0x5   :  { %p321_p2 = pnand %p319_p1, %p316_p0 }
   0x7   :  { %324 = shalt.err (!%p321_p2)
}
   0x8   :  { %s325_s27 = scalar_lea.vmem %s18_s19, 256  ;;  %p330_p4 = scmp.lt.s32.totalorder %s18_s19, %s18_s19 }
   0x9   :  { %p326_p3 = scmp.ne.s32.totalorder %s18_s19, %s325_s27  ;;  %p331_p5 = scmp.lt.s32.totalorder %s325_s27, %s325_s27 }
   0xb   :  { %p332_p6 = por %p331_p5, %p330_p4 }
   0xd   :  { %p333_p7 = pnand %p332_p6, %p326_p3 }
   0xf   :  { %336 = shalt.err (!%p333_p7)
}
  0x10   :  { %s364_s28 = smov 128   ;;  %s365_s29 = smov 8  }
  0x11   :  { %23 = dma.hbm_to_vmem [thread:$0]  %s445_s0, 256, %s18_s19, [#allocation4], %s364_s28, %s364_s28, %s365_s29  }
  0x12   :  { %359 = dma.done.wait [#allocation4], 256  }
  0x13   :  { %360 = vsyncadd [#allocation4], 4294967040  ;;  %vm50_vm0 = vcmask 1043456   ;;  %v41_v0 = vld [vmem:[#allocation3] sm:$0xff]  ;;  %v42_v1 = vld [vmem:[#allocation3 + $0x8] sm:$0xff]  ;;  %vm39_vm1 = vcmask 25600   ;;  %v63_v12 = vlaneseq }
  0x14   :  { %v46_v2 = vcombine.high %v41_v0, %v41_v0  ;;  %v51_v3 = vsel %vm50_vm0, %v41_v0, 0.0  ;;  %v47_v4 = vcombine.high %v42_v1, %v42_v1  ;;  %v56_v6 = vsel %vm50_vm0, %v42_v1, 0.0  ;;  %v83_v11 = vld [vmem:[%s446_s1] sm:$0xf] }
  0x15   :  { %v366_v10 = vmov 0.0   ;;  %vm367_vm2 = vmmov 0   ;;  %v64_v13 = vand.u32 127, %v63_v12  ;;  %v66_v14 = vshrl.u32 %v63_v12, 7  ;;  %v170_v24 = vld [vmem:[%s448_s3] sm:$0x3] }
  0x16   :  { %v52_v5 = vsel %vm50_vm0, %v46_v2, 0.0  ;;  %v57_v7 = vsel %vm50_vm0, %v47_v4, 0.0  ;;  %40 = vst.msk [vmem:[#allocation2] sm:$0x3] %vm39_vm1, %v366_v10  ;;  %293 = vmatprep.subr.mxu0 %v366_v10  ;;  %298 = vmatprep.subr.mxu1 %v366_v10  ;;  %vm73_vm3 = vcmask 1041409   ;;  %vm91_vm4 = vcmask 31744  }
  0x17   :  { %v53_v8 = vadd.f32 %v52_v5, %v51_v3  ;;  %v58_v9 = vadd.f32 %v57_v7, %v56_v6  ;;  %294 = vmatpush3.msk.msra.mxu0 %vm50_vm0, %v83_v11  ;;  %295 = vmatprep.mubr.msk.f32.mxu0 %vm367_vm2, %v366_v10  ;;  %v67_v16 = vsub.s32 %v64_v13, %v66_v14  ;;  %vm182_vm5 = vcmask 1041408   ;;  %v283_v25 = vld [vmem:[%s447_s2] ss:$0 sm:$0xff]  ;;  %s368_s2 = smov [#allocation6]  }
  0x18   :  { %300 = vmatprep.mubr.msk.f32.mxu1 %vm367_vm2, %v366_v10  ;;  %299 = vmatpush3.msk.msra.mxu1 %vm182_vm5, %v170_v24  ;;  %vm178_vm6 = vcmask 15360   ;;  %v286_v31 = vld [vmem:[%s449_s4] ss:$0 sm:$0xff]  ;;  %s274_s3 = sshll.u32 %s368_s2, 4  ;;  %s275_s3 = int_to_ptr.vmem [resolvable:$true] %s274_s3 }
  0x19   :  { %54 = vadd.xlane.f32.xlu0 %v53_v8  ;;  %s337_s4 = scalar_lea.vmem %s275_s3, 32  ;;  %p342_p9 = scmp.lt.s32.totalorder %s275_s3, %s275_s3 }
  0x1a   :  { %p338_p8 = scmp.ne.s32.totalorder %s275_s3, %s337_s4  ;;  %p343_p10 = scmp.lt.s32.totalorder %s337_s4, %s337_s4 }
  0x1c   :  { %p344_p11 = por %p343_p10, %p342_p9 }
  0x1d   :  { %59 = vadd.xlane.f32.xlu0 %v58_v9  ;;  %v43_v20 = vld [vmem:[#allocation2] sm:$0x3] }
  0x1e   :  { %p345_p12 = pnand %p344_p11, %p338_p8 }
  0xa6   :  { %v55_v15 = vpop.xlane.xlu0 %54 }
  0xa7   :  { %v68_v18 = vrot.slane %v55_v15, %v67_v16 }
  0xaa   :  { %v60_v17 = vpop.xlane.xlu0 %59 }
  0xab   :  { %v72_v19 = vrot.slane %v60_v17, %v67_v16 }
  0xad   :  { %v74_v21 = vsel %vm73_vm3, %v72_v19, %v68_v18 }
  0xae   :  { %v76_v22 = vadd.f32 %v74_v21, %v43_v20 }
  0xb0   :  { %78 = vst.msk [vmem:[#allocation2] sm:$0x3] %vm39_vm1, %v76_v22 }
  0xb7   :  { %v82_v23 = vld [vmem:[#allocation2] sm:$0x3] }
  0xb8   :  { %296 = vmatmul.mubr.msk.f32.vlgmr.msra.gmra.mrb[0].mxu0 %vm91_vm4, %v82_v23 }
 0x18b   :  { %v164_v26 = vpop.f32.mrb[0].mxu0 }
 0x18c   :  { %v165_v27 = vadd.f32 %v283_v25, %v164_v26  ;;  %v297_v28 = vpop.f32.mrb[1].mxu0 }
 0x18e   :  { %v168_v29 = vmax.f32 %v165_v27, 0.0 }
 0x190   :  { %v169_v30 = vmin.f32 %v168_v29, 6.0 }
 0x192   :  { %301 = vmatmul.mubr.msk.f32.vlgmr.msra.gmra.mrb[0].mxu1 %vm178_vm6, %v169_v30 }
 0x265   :  { %v252_v32 = vpop.f32.mrb[0].mxu1 }
 0x266   :  { %v253_v33 = vadd.f32 %v286_v31, %v252_v32  ;;  %v302_v34 = vpop.f32.mrb[1].mxu1 }
 0x268   :  { %v256_v35 = vsel %vm182_vm5, %v253_v33, -inf }
 0x269   :  { %257 = vmax.xlane.f32.xlu1 %v256_v35 }
 0x2f6   :  { %v258_v36 = vpop.xlane.xlu1 %257 }
 0x2f7   :  { %v259_v37 = vsub.f32 %v253_v33, %v258_v36 }
 0x2f9   :  { %v260_v38 = vmul.f32 1.442695, %v259_v37 }
 0x2fb   :  { %311 = vpow2.f32 %v260_v38 }
 0x305   :  { %v312_v39 = vpop.eup %311 }
 0x306   :  { %v262_v40 = vsel %vm182_vm5, %v312_v39, 0.0 }
 0x307   :  { %263 = vadd.xlane.f32.xlu1 %v262_v40 }
 0x394   :  { %v264_v41 = vpop.xlane.xlu1 %263 }
 0x395   :  { %313 = vrcp.f32 %v264_v41 }
 0x39f   :  { %v314_v42 = vpop.eup %313 }
 0x3a0   :  { %v266_v43 = vmul.f32 %v314_v42, %v312_v39 }
 0x3a2   :  { %267 = vst [vmem:[#allocation6] sm:$0x3] %v266_v43 }
 0x3a3   :  { %348 = shalt.err (!%p345_p12)
}
 0x3a4   :  { %s349_s15 = scalar_lea.hbm %s450_s5, 32 }
 0x3a5   :  { %p350_p13 = scmp.ne.s32.totalorder %s450_s5, %s349_s15  ;;  %p353_p0 = scmp.lt.u32.totalorder %s349_s15, %s450_s5 }
 0x3a7   :  { %p355_p1 = pnand %p353_p0, %p350_p13 }
 0x3a9   :  { %358 = shalt.err (!%p355_p1)
}
 0x3aa   :  { %277 = dma.vmem_to_hbm [thread:$0]  %s275_s3, 32, %s450_s5, [#allocation5]  }
 0x3ab   :  { %361 = dma.done.wait [#allocation5], 32  }
 0x3ac   :  { %362 = vsyncadd [#allocation5], 4294967264 }
 0x3ad   :  { %281 = vsyncpa [#allocation4], 1 }
 0x3ae   :  { %282 = vsyncpa [#allocation5], 1 }

</bundles_post_ra>
